<compile_context>
chip_gen: v6e
topology: v6e:2x2x1
jax: 0.10.0
libtpu: 0.0.40
codegen_flags: <defaults>
</compile_context>

<pallas_src>
import jax
import jax.numpy as jnp
from jax.experimental import pallas as pl
from jax.experimental.pallas import tpu as pltpu

# ZBL constants (identical to the PyTorch module)
_PZBL = 0.23
_A0 = 0.4685
_C1, _C2, _C3, _C4 = 0.02817, 0.28022, 0.50986, 0.18175
_D1, _D2, _D3, _D4 = -0.20162, -0.4029, -0.94229, -3.1998

_LANE = 128
# Up to (1024, 128) f32 per block; sweepable 512..2048, 1024 is the safe
# cross-generation choice (per-step overhead amortized, ~85% HBM roofline).
_MAX_BLOCK_ROWS = 1024


def _zbl_kernel(s_tab_ref, prod_tab_ref, idx_ref, r_ref, out_ref):
    """ZBL screened-Coulomb energy for one (block_rows, 128) tile.

    s_tab_ref, prod_tab_ref : (T*T,) f32 in SMEM
        s_tab[ti*T+tj]    = (Z[ti]**pzbl + Z[tj]**pzbl) / a0
        prod_tab[ti*T+tj] = qqr2exesquare * Z[ti] * Z[tj]
    idx_ref : (block_rows, 128) int32  pair index ti*T+tj per edge
    r_ref   : (block_rows, 128) f32    edge distances
    """
    idx = idx_ref[...]
    r = r_ref[...]

    # Gather the two per-pair coefficients via an unrolled select chain over
    # the tiny type-pair table (T*T entries, scalar SMEM reads -> vsplat).
    s = jnp.zeros_like(r)
    prod = jnp.zeros_like(r)
    for k in range(s_tab_ref.shape[0]):
        hit = idx == k
        s = jnp.where(hit, s_tab_ref[k], s)
        prod = jnp.where(hit, prod_tab_ref[k], prod)

    x = s * r
    psi = (_C1 * jnp.exp(_D1 * x)
           + _C2 * jnp.exp(_D2 * x)
           + _C3 * jnp.exp(_D3 * x)
           + _C4 * jnp.exp(_D4 * x))

    # EUP approximate reciprocal + two Newton refinements (VPU, free slack)
    # -> full f32 accuracy without an exact divide.
    inv = pl.reciprocal(r, approx=True)
    inv = inv * (2.0 - r * inv)
    inv = inv * (2.0 - r * inv)

    out_ref[...] = prod * inv * psi


def zbl_energy(Z, r, atom_types, edge_index, qqr2exesquare,
               max_block_rows=_MAX_BLOCK_ROWS):
    """JAX/Pallas equivalent of _ZBL.forward.

    Z:           (num_types,)   float   atomic numbers per type
    r:           (num_edges,)   float   edge distances (strictly positive)
    atom_types:  (num_atoms,)   int32   type index per atom
    edge_index:  (2, num_edges) int32   atom indices per edge
    returns:     (num_edges,)   float32 per-edge ZBL energy
    """
    assert max_block_rows % 8 == 0
    num_edges = r.shape[0]
    T = Z.shape[0]

    # --- tiny per-type-pair tables (T*T scalars each; go to SMEM) ----------
    Zf = Z.astype(jnp.float32)
    Zpow = jnp.power(Zf, _PZBL)
    s_tab = ((Zpow[:, None] + Zpow[None, :]) / _A0).reshape(-1)
    prod_tab = (jnp.float32(qqr2exesquare) * Zf[:, None] * Zf[None, :]).reshape(-1)

    # --- glue: torch.index_select equivalents -> single per-edge pair index -
    edge_types = jnp.take(atom_types, edge_index.reshape(-1), axis=0).reshape(2, -1)
    ti, tj = edge_types[0], edge_types[1]
    pair_idx = (ti * T + tj).astype(jnp.int32)
    r32 = r.astype(jnp.float32)

    # --- pad only to a multiple of 128 lanes (<=127 phantom edges) ----------
    rows = pl.cdiv(num_edges, _LANE)
    padded_edges = rows * _LANE
    pad = padded_edges - num_edges
    if pad:
        pair_idx = jnp.pad(pair_idx, (0, pad))                  # idx 0 is valid
        r32 = jnp.pad(r32, (0, pad), constant_values=1.0)       # avoid 1/0

    idx2 = pair_idx.reshape(rows, _LANE)
    r2 = r32.reshape(rows, _LANE)

    # --- balanced block rows: large blocks, minimal tail-block waste --------
    num_blocks = pl.cdiv(rows, max_block_rows)
    block_rows = min(max_block_rows, 8 * pl.cdiv(pl.cdiv(rows, num_blocks), 8))
    grid = pl.cdiv(rows, block_rows)   # overhanging tail block is masked

    spec = pl.BlockSpec((block_rows, _LANE), lambda i: (i, 0))
    smem_spec = pl.BlockSpec(memory_space=pltpu.MemorySpace.SMEM)

    out2 = pl.pallas_call(
        _zbl_kernel,
        out_shape=jax.ShapeDtypeStruct((rows, _LANE), jnp.float32),
        grid=(grid,),
        in_specs=[smem_spec, smem_spec, spec, spec],
        out_specs=spec,
        compiler_params=pltpu.CompilerParams(
            dimension_semantics=("parallel",)),
    )(s_tab, prod_tab, idx2, r2)

    return out2.reshape(-1)[:num_edges]


def _zbl_reference(Z, r, atom_types, edge_index, qqr2exesquare):
    """Pure-JAX reference mirroring the PyTorch forward exactly."""
    edge_types = jnp.take(atom_types, edge_index.reshape(-1), axis=0)
    Zg = jnp.take(Z.astype(jnp.float32), edge_types.reshape(-1),
                  axis=0).reshape(2, -1)
    Zi, Zj = Zg[0], Zg[1]
    x = (jnp.power(Zi, _PZBL) + jnp.power(Zj, _PZBL)) * r / _A0
    psi = (_C1 * jnp.exp(_D1 * x) + _C2 * jnp.exp(_D2 * x)
           + _C3 * jnp.exp(_D3 * x) + _C4 * jnp.exp(_D4 * x))
    return qqr2exesquare * (Zi * Zj / r) * psi


if __name__ == "__main__":
    key = jax.random.PRNGKey(0)
    keys = jax.random.split(key, 9)

    num_types = 4
    num_atoms = 32
    qqr2exesquare = 14.399645  # e^2 / (4*pi*eps0) in eV*Angstrom

    # Atomic numbers per type (H, C, N, O)
    Z = jnp.array([1.0, 6.0, 7.0, 8.0], dtype=jnp.float32)

    RTOL, ATOL = 1e-4, 1e-6

    def run_case(ka, ke, kr, num_edges, **kw):
        atom_types = jax.random.randint(ka, (num_atoms,), 0, num_types,
                                        dtype=jnp.int32)
        edge_index = jax.random.randint(ke, (2, num_edges), 0, num_atoms,
                                        dtype=jnp.int32)
        r = 0.5 + 5.0 * jax.random.uniform(kr, (num_edges,), dtype=jnp.float32)
        eng = jax.block_until_ready(
            zbl_energy(Z, r, atom_types, edge_index, qqr2exesquare, **kw))
        ref = _zbl_reference(Z, r, atom_types, edge_index, qqr2exesquare)
        assert eng.shape == (num_edges,)
        err = float(jnp.max(jnp.abs(eng - ref)))
        assert jnp.allclose(eng, ref, rtol=RTOL, atol=ATOL), \
            f"num_edges={num_edges}: max abs err {err}"

    # Case 1: edge count that tiles exactly (no padding at all).
    run_case(keys[0], keys[1], keys[2], 2048)

    # Case 2: ragged edge count (pads 3000 -> 3072, single block).
    run_case(keys[3], keys[4], keys[5], 3000)

    # Case 3: multi-block grid with an overhanging (masked) tail block.
    run_case(keys[6], keys[7], keys[8], 2600, max_block_rows=8)

    print("KERNEL_OK")
</pallas_src>

<mosaic_0001>
module attributes {stable_mosaic.version = 11 : i64} {
  func.func @_zbl_kernel(%arg0: i32, %arg1: memref<16xf32, #tpu.memory_space<smem>>, %arg2: memref<16xf32, #tpu.memory_space<smem>>, %arg3: memref<16x128xi32, #tpu.memory_space<vmem>>, %arg4: memref<16x128xf32, #tpu.memory_space<vmem>>, %arg5: memref<16x128xf32, #tpu.memory_space<vmem>>) attributes {dimension_semantics = [#tpu.dimension_semantics<parallel>], iteration_bounds = array<i64: 1>, scalar_prefetch = 0 : i64, scratch_operands = 0 : i64, tpu.core_type = #tpu.core_type<tc>, window_params = [{transform_indices = @transform_0, window_bounds = array<i64: 16>}, {transform_indices = @transform_1, window_bounds = array<i64: 16>}, {transform_indices = @transform_2, window_bounds = array<i64: 16, 128>}, {transform_indices = @transform_3, window_bounds = array<i64: 16, 128>}, {transform_indices = @transform_4, window_bounds = array<i64: 16, 128>}]} {
    %c0 = arith.constant 0 : index
    %c0_0 = arith.constant 0 : index
    %0 = vector.load %arg3[%c0, %c0_0] : memref<16x128xi32, #tpu.memory_space<vmem>>, vector<16x128xi32>
    %c0_1 = arith.constant 0 : index
    %c0_2 = arith.constant 0 : index
    %1 = vector.load %arg4[%c0_1, %c0_2] : memref<16x128xf32, #tpu.memory_space<vmem>>, vector<16x128xf32>
    %cst = arith.constant 0.000000e+00 : f32
    %2 = vector.broadcast %cst : f32 to vector<16x128xf32>
    %cst_3 = arith.constant 0.000000e+00 : f32
    %3 = vector.broadcast %cst_3 : f32 to vector<16x128xf32>
    %c0_i32 = arith.constant 0 : i32
    %4 = vector.broadcast %c0_i32 : i32 to vector<16x128xi32>
    %5 = arith.cmpi eq, %0, %4 : vector<16x128xi32>
    %c0_4 = arith.constant 0 : index
    %6 = memref.load %arg1[%c0_4] : memref<16xf32, #tpu.memory_space<smem>>
    %7 = vector.broadcast %6 : f32 to vector<16x128xf32>
    %8 = arith.select %5, %7, %2 : vector<16x128xi1>, vector<16x128xf32>
    %c0_5 = arith.constant 0 : index
    %9 = memref.load %arg2[%c0_5] : memref<16xf32, #tpu.memory_space<smem>>
    %10 = vector.broadcast %9 : f32 to vector<16x128xf32>
    %11 = arith.select %5, %10, %3 : vector<16x128xi1>, vector<16x128xf32>
    %c1_i32 = arith.constant 1 : i32
    %12 = vector.broadcast %c1_i32 : i32 to vector<16x128xi32>
    %13 = arith.cmpi eq, %0, %12 : vector<16x128xi32>
    %c1 = arith.constant 1 : index
    %14 = memref.load %arg1[%c1] : memref<16xf32, #tpu.memory_space<smem>>
    %15 = vector.broadcast %14 : f32 to vector<16x128xf32>
    %16 = arith.select %13, %15, %8 : vector<16x128xi1>, vector<16x128xf32>
    %c1_6 = arith.constant 1 : index
    %17 = memref.load %arg2[%c1_6] : memref<16xf32, #tpu.memory_space<smem>>
    %18 = vector.broadcast %17 : f32 to vector<16x128xf32>
    %19 = arith.select %13, %18, %11 : vector<16x128xi1>, vector<16x128xf32>
    %c2_i32 = arith.constant 2 : i32
    %20 = vector.broadcast %c2_i32 : i32 to vector<16x128xi32>
    %21 = arith.cmpi eq, %0, %20 : vector<16x128xi32>
    %c2 = arith.constant 2 : index
    %22 = memref.load %arg1[%c2] : memref<16xf32, #tpu.memory_space<smem>>
    %23 = vector.broadcast %22 : f32 to vector<16x128xf32>
    %24 = arith.select %21, %23, %16 : vector<16x128xi1>, vector<16x128xf32>
    %c2_7 = arith.constant 2 : index
    %25 = memref.load %arg2[%c2_7] : memref<16xf32, #tpu.memory_space<smem>>
    %26 = vector.broadcast %25 : f32 to vector<16x128xf32>
    %27 = arith.select %21, %26, %19 : vector<16x128xi1>, vector<16x128xf32>
    %c3_i32 = arith.constant 3 : i32
    %28 = vector.broadcast %c3_i32 : i32 to vector<16x128xi32>
    %29 = arith.cmpi eq, %0, %28 : vector<16x128xi32>
    %c3 = arith.constant 3 : index
    %30 = memref.load %arg1[%c3] : memref<16xf32, #tpu.memory_space<smem>>
    %31 = vector.broadcast %30 : f32 to vector<16x128xf32>
    %32 = arith.select %29, %31, %24 : vector<16x128xi1>, vector<16x128xf32>
    %c3_8 = arith.constant 3 : index
    %33 = memref.load %arg2[%c3_8] : memref<16xf32, #tpu.memory_space<smem>>
    %34 = vector.broadcast %33 : f32 to vector<16x128xf32>
    %35 = arith.select %29, %34, %27 : vector<16x128xi1>, vector<16x128xf32>
    %c4_i32 = arith.constant 4 : i32
    %36 = vector.broadcast %c4_i32 : i32 to vector<16x128xi32>
    %37 = arith.cmpi eq, %0, %36 : vector<16x128xi32>
    %c4 = arith.constant 4 : index
    %38 = memref.load %arg1[%c4] : memref<16xf32, #tpu.memory_space<smem>>
    %39 = vector.broadcast %38 : f32 to vector<16x128xf32>
    %40 = arith.select %37, %39, %32 : vector<16x128xi1>, vector<16x128xf32>
    %c4_9 = arith.constant 4 : index
    %41 = memref.load %arg2[%c4_9] : memref<16xf32, #tpu.memory_space<smem>>
    %42 = vector.broadcast %41 : f32 to vector<16x128xf32>
    %43 = arith.select %37, %42, %35 : vector<16x128xi1>, vector<16x128xf32>
    %c5_i32 = arith.constant 5 : i32
    %44 = vector.broadcast %c5_i32 : i32 to vector<16x128xi32>
    %45 = arith.cmpi eq, %0, %44 : vector<16x128xi32>
    %c5 = arith.constant 5 : index
    %46 = memref.load %arg1[%c5] : memref<16xf32, #tpu.memory_space<smem>>
    %47 = vector.broadcast %46 : f32 to vector<16x128xf32>
    %48 = arith.select %45, %47, %40 : vector<16x128xi1>, vector<16x128xf32>
    %c5_10 = arith.constant 5 : index
    %49 = memref.load %arg2[%c5_10] : memref<16xf32, #tpu.memory_space<smem>>
    %50 = vector.broadcast %49 : f32 to vector<16x128xf32>
    %51 = arith.select %45, %50, %43 : vector<16x128xi1>, vector<16x128xf32>
    %c6_i32 = arith.constant 6 : i32
    %52 = vector.broadcast %c6_i32 : i32 to vector<16x128xi32>
    %53 = arith.cmpi eq, %0, %52 : vector<16x128xi32>
    %c6 = arith.constant 6 : index
    %54 = memref.load %arg1[%c6] : memref<16xf32, #tpu.memory_space<smem>>
    %55 = vector.broadcast %54 : f32 to vector<16x128xf32>
    %56 = arith.select %53, %55, %48 : vector<16x128xi1>, vector<16x128xf32>
    %c6_11 = arith.constant 6 : index
    %57 = memref.load %arg2[%c6_11] : memref<16xf32, #tpu.memory_space<smem>>
    %58 = vector.broadcast %57 : f32 to vector<16x128xf32>
    %59 = arith.select %53, %58, %51 : vector<16x128xi1>, vector<16x128xf32>
    %c7_i32 = arith.constant 7 : i32
    %60 = vector.broadcast %c7_i32 : i32 to vector<16x128xi32>
    %61 = arith.cmpi eq, %0, %60 : vector<16x128xi32>
    %c7 = arith.constant 7 : index
    %62 = memref.load %arg1[%c7] : memref<16xf32, #tpu.memory_space<smem>>
    %63 = vector.broadcast %62 : f32 to vector<16x128xf32>
    %64 = arith.select %61, %63, %56 : vector<16x128xi1>, vector<16x128xf32>
    %c7_12 = arith.constant 7 : index
    %65 = memref.load %arg2[%c7_12] : memref<16xf32, #tpu.memory_space<smem>>
    %66 = vector.broadcast %65 : f32 to vector<16x128xf32>
    %67 = arith.select %61, %66, %59 : vector<16x128xi1>, vector<16x128xf32>
    %c8_i32 = arith.constant 8 : i32
    %68 = vector.broadcast %c8_i32 : i32 to vector<16x128xi32>
    %69 = arith.cmpi eq, %0, %68 : vector<16x128xi32>
    %c8 = arith.constant 8 : index
    %70 = memref.load %arg1[%c8] : memref<16xf32, #tpu.memory_space<smem>>
    %71 = vector.broadcast %70 : f32 to vector<16x128xf32>
    %72 = arith.select %69, %71, %64 : vector<16x128xi1>, vector<16x128xf32>
    %c8_13 = arith.constant 8 : index
    %73 = memref.load %arg2[%c8_13] : memref<16xf32, #tpu.memory_space<smem>>
    %74 = vector.broadcast %73 : f32 to vector<16x128xf32>
    %75 = arith.select %69, %74, %67 : vector<16x128xi1>, vector<16x128xf32>
    %c9_i32 = arith.constant 9 : i32
    %76 = vector.broadcast %c9_i32 : i32 to vector<16x128xi32>
    %77 = arith.cmpi eq, %0, %76 : vector<16x128xi32>
    %c9 = arith.constant 9 : index
    %78 = memref.load %arg1[%c9] : memref<16xf32, #tpu.memory_space<smem>>
    %79 = vector.broadcast %78 : f32 to vector<16x128xf32>
    %80 = arith.select %77, %79, %72 : vector<16x128xi1>, vector<16x128xf32>
    %c9_14 = arith.constant 9 : index
    %81 = memref.load %arg2[%c9_14] : memref<16xf32, #tpu.memory_space<smem>>
    %82 = vector.broadcast %81 : f32 to vector<16x128xf32>
    %83 = arith.select %77, %82, %75 : vector<16x128xi1>, vector<16x128xf32>
    %c10_i32 = arith.constant 10 : i32
    %84 = vector.broadcast %c10_i32 : i32 to vector<16x128xi32>
    %85 = arith.cmpi eq, %0, %84 : vector<16x128xi32>
    %c10 = arith.constant 10 : index
    %86 = memref.load %arg1[%c10] : memref<16xf32, #tpu.memory_space<smem>>
    %87 = vector.broadcast %86 : f32 to vector<16x128xf32>
    %88 = arith.select %85, %87, %80 : vector<16x128xi1>, vector<16x128xf32>
    %c10_15 = arith.constant 10 : index
    %89 = memref.load %arg2[%c10_15] : memref<16xf32, #tpu.memory_space<smem>>
    %90 = vector.broadcast %89 : f32 to vector<16x128xf32>
    %91 = arith.select %85, %90, %83 : vector<16x128xi1>, vector<16x128xf32>
    %c11_i32 = arith.constant 11 : i32
    %92 = vector.broadcast %c11_i32 : i32 to vector<16x128xi32>
    %93 = arith.cmpi eq, %0, %92 : vector<16x128xi32>
    %c11 = arith.constant 11 : index
    %94 = memref.load %arg1[%c11] : memref<16xf32, #tpu.memory_space<smem>>
    %95 = vector.broadcast %94 : f32 to vector<16x128xf32>
    %96 = arith.select %93, %95, %88 : vector<16x128xi1>, vector<16x128xf32>
    %c11_16 = arith.constant 11 : index
    %97 = memref.load %arg2[%c11_16] : memref<16xf32, #tpu.memory_space<smem>>
    %98 = vector.broadcast %97 : f32 to vector<16x128xf32>
    %99 = arith.select %93, %98, %91 : vector<16x128xi1>, vector<16x128xf32>
    %c12_i32 = arith.constant 12 : i32
    %100 = vector.broadcast %c12_i32 : i32 to vector<16x128xi32>
    %101 = arith.cmpi eq, %0, %100 : vector<16x128xi32>
    %c12 = arith.constant 12 : index
    %102 = memref.load %arg1[%c12] : memref<16xf32, #tpu.memory_space<smem>>
    %103 = vector.broadcast %102 : f32 to vector<16x128xf32>
    %104 = arith.select %101, %103, %96 : vector<16x128xi1>, vector<16x128xf32>
    %c12_17 = arith.constant 12 : index
    %105 = memref.load %arg2[%c12_17] : memref<16xf32, #tpu.memory_space<smem>>
    %106 = vector.broadcast %105 : f32 to vector<16x128xf32>
    %107 = arith.select %101, %106, %99 : vector<16x128xi1>, vector<16x128xf32>
    %c13_i32 = arith.constant 13 : i32
    %108 = vector.broadcast %c13_i32 : i32 to vector<16x128xi32>
    %109 = arith.cmpi eq, %0, %108 : vector<16x128xi32>
    %c13 = arith.constant 13 : index
    %110 = memref.load %arg1[%c13] : memref<16xf32, #tpu.memory_space<smem>>
    %111 = vector.broadcast %110 : f32 to vector<16x128xf32>
    %112 = arith.select %109, %111, %104 : vector<16x128xi1>, vector<16x128xf32>
    %c13_18 = arith.constant 13 : index
    %113 = memref.load %arg2[%c13_18] : memref<16xf32, #tpu.memory_space<smem>>
    %114 = vector.broadcast %113 : f32 to vector<16x128xf32>
    %115 = arith.select %109, %114, %107 : vector<16x128xi1>, vector<16x128xf32>
    %c14_i32 = arith.constant 14 : i32
    %116 = vector.broadcast %c14_i32 : i32 to vector<16x128xi32>
    %117 = arith.cmpi eq, %0, %116 : vector<16x128xi32>
    %c14 = arith.constant 14 : index
    %118 = memref.load %arg1[%c14] : memref<16xf32, #tpu.memory_space<smem>>
    %119 = vector.broadcast %118 : f32 to vector<16x128xf32>
    %120 = arith.select %117, %119, %112 : vector<16x128xi1>, vector<16x128xf32>
    %c14_19 = arith.constant 14 : index
    %121 = memref.load %arg2[%c14_19] : memref<16xf32, #tpu.memory_space<smem>>
    %122 = vector.broadcast %121 : f32 to vector<16x128xf32>
    %123 = arith.select %117, %122, %115 : vector<16x128xi1>, vector<16x128xf32>
    %c15_i32 = arith.constant 15 : i32
    %124 = vector.broadcast %c15_i32 : i32 to vector<16x128xi32>
    %125 = arith.cmpi eq, %0, %124 : vector<16x128xi32>
    %c15 = arith.constant 15 : index
    %126 = memref.load %arg1[%c15] : memref<16xf32, #tpu.memory_space<smem>>
    %127 = vector.broadcast %126 : f32 to vector<16x128xf32>
    %128 = arith.select %125, %127, %120 : vector<16x128xi1>, vector<16x128xf32>
    %c15_20 = arith.constant 15 : index
    %129 = memref.load %arg2[%c15_20] : memref<16xf32, #tpu.memory_space<smem>>
    %130 = vector.broadcast %129 : f32 to vector<16x128xf32>
    %131 = arith.select %125, %130, %123 : vector<16x128xi1>, vector<16x128xf32>
    %132 = arith.mulf %128, %1 : vector<16x128xf32>
    %cst_21 = arith.constant -2.016200e-01 : f32
    %133 = vector.broadcast %cst_21 : f32 to vector<16x128xf32>
    %134 = arith.mulf %133, %132 : vector<16x128xf32>
    %135 = math.exp %134 : vector<16x128xf32>
    %cst_22 = arith.constant 2.817000e-02 : f32
    %136 = vector.broadcast %cst_22 : f32 to vector<16x128xf32>
    %137 = arith.mulf %136, %135 : vector<16x128xf32>
    %cst_23 = arith.constant -4.029000e-01 : f32
    %138 = vector.broadcast %cst_23 : f32 to vector<16x128xf32>
    %139 = arith.mulf %138, %132 : vector<16x128xf32>
    %140 = math.exp %139 : vector<16x128xf32>
    %cst_24 = arith.constant 2.802200e-01 : f32
    %141 = vector.broadcast %cst_24 : f32 to vector<16x128xf32>
    %142 = arith.mulf %141, %140 : vector<16x128xf32>
    %143 = arith.addf %137, %142 : vector<16x128xf32>
    %cst_25 = arith.constant -9.422900e-01 : f32
    %144 = vector.broadcast %cst_25 : f32 to vector<16x128xf32>
    %145 = arith.mulf %144, %132 : vector<16x128xf32>
    %146 = math.exp %145 : vector<16x128xf32>
    %cst_26 = arith.constant 5.098600e-01 : f32
    %147 = vector.broadcast %cst_26 : f32 to vector<16x128xf32>
    %148 = arith.mulf %147, %146 : vector<16x128xf32>
    %149 = arith.addf %143, %148 : vector<16x128xf32>
    %cst_27 = arith.constant -3.199800e+00 : f32
    %150 = vector.broadcast %cst_27 : f32 to vector<16x128xf32>
    %151 = arith.mulf %150, %132 : vector<16x128xf32>
    %152 = math.exp %151 : vector<16x128xf32>
    %cst_28 = arith.constant 1.817500e-01 : f32
    %153 = vector.broadcast %cst_28 : f32 to vector<16x128xf32>
    %154 = arith.mulf %153, %152 : vector<16x128xf32>
    %155 = arith.addf %149, %154 : vector<16x128xf32>
    %156 = tpu.reciprocal %1 {approx = true} : vector<16x128xf32> -> vector<16x128xf32>
    %157 = arith.mulf %1, %156 : vector<16x128xf32>
    %cst_29 = arith.constant 2.000000e+00 : f32
    %158 = vector.broadcast %cst_29 : f32 to vector<16x128xf32>
    %159 = arith.subf %158, %157 : vector<16x128xf32>
    %160 = arith.mulf %156, %159 : vector<16x128xf32>
    %161 = arith.mulf %1, %160 : vector<16x128xf32>
    %cst_30 = arith.constant 2.000000e+00 : f32
    %162 = vector.broadcast %cst_30 : f32 to vector<16x128xf32>
    %163 = arith.subf %162, %161 : vector<16x128xf32>
    %164 = arith.mulf %160, %163 : vector<16x128xf32>
    %165 = arith.mulf %131, %164 : vector<16x128xf32>
    %166 = arith.mulf %165, %155 : vector<16x128xf32>
    %c0_31 = arith.constant 0 : index
    %c0_32 = arith.constant 0 : index
    %167 = vector.load %arg5[%c0_31, %c0_32] : memref<16x128xf32, #tpu.memory_space<vmem>>, vector<16x128xf32>
    tpu.vector_store %arg5[%c0_31, %c0_32], %166 {strides = array<i32>} : memref<16x128xf32, #tpu.memory_space<vmem>>, vector<16x128xf32>,
    return
  }
  func.func @transform_0(%arg0: i32) -> i32 {
    %c0_i32 = arith.constant 0 : i32
    %c0_i32_0 = arith.constant 0 : i32
    return %c0_i32 : i32
  }
  func.func @transform_1(%arg0: i32) -> i32 {
    %c0_i32 = arith.constant 0 : i32
    %c0_i32_0 = arith.constant 0 : i32
    return %c0_i32 : i32
  }
  func.func @transform_2(%arg0: i32) -> (i32, i32) {
    %c0_i32 = arith.constant 0 : i32
    %c0_i32_0 = arith.constant 0 : i32
    return %arg0, %c0_i32 : i32, i32
  }
  func.func @transform_3(%arg0: i32) -> (i32, i32) {
    %c0_i32 = arith.constant 0 : i32
    %c0_i32_0 = arith.constant 0 : i32
    return %arg0, %c0_i32 : i32, i32
  }
  func.func @transform_4(%arg0: i32) -> (i32, i32) {
    %c0_i32 = arith.constant 0 : i32
    %c0_i32_0 = arith.constant 0 : i32
    return %arg0, %c0_i32 : i32, i32
  }
}

</mosaic_0001>

<bundles_post_ra>
// kernel: tpu_custom_call.1
= control target key start
LH: loop header
LB: loop body
LE: loop exit
PB: predicated region body
PF: predicated region fallthrough
CT: control target
= control target key end

     0   :  { %9 = vsyncpa [#allocation5], 0  ;;  %s750_s0 = inlined_call_operand.hbm [shape: f32[16], index: 0, kind: input, shape index: {}]   ;;  %s751_s1 = inlined_call_operand.vmem [shape: f32[16], index: 1, kind: input, shape index: {}]   ;;  %s752_s2 = inlined_call_operand.hbm [shape: s32[16,128], index: 2, kind: input, shape index: {}]   ;;  %s753_s3 = inlined_call_operand.hbm [shape: f32[16,128], index: 3, kind: input, shape index: {}]   ;;  %s754_s4 = inlined_call_operand.hbm [shape: f32[16,128], index: 4, kind: output, shape index: {}]  }
   0x1   :  { %10 = vsyncpa [#allocation6], 0 }
   0x2   :  { %11 = vsyncpa [#allocation3], 0 }
   0x3   :  { %12 = vsyncpa [#allocation10], 0 }
   0x4   :  { %13 = vsyncpa [#allocation4], 0  ;;  %s28_s17 = sshll.u32 %s751_s1, 4  ;;  %s460_s18 = smov [#allocation2]   ;;  %s29_s17 = int_to_ptr.vmem [resolvable:$true] %s28_s17 }
   0x5   :  { %21 = dma.hbm_to_smem %s750_s0, 16, %s460_s18, [#allocation5]  }
   0x6   :  { %s378_s21 = scalar_lea.vmem %s29_s17, 16  ;;  %p383_p1 = scmp.lt.s32.totalorder %s29_s17, %s29_s17 }
   0x7   :  { %p379_p0 = scmp.ne.s32.totalorder %s29_s17, %s378_s21  ;;  %p384_p2 = scmp.lt.s32.totalorder %s378_s21, %s378_s21 }
   0x9   :  { %p385_p3 = por %p384_p2, %p383_p1 }
   0xb   :  { %p386_p4 = pnand %p385_p3, %p379_p0 }
   0xd   :  { %389 = shalt.err (!%p386_p4)
}
   0xe   :  { %s461_s22 = smov [#allocation7]   ;;  %s462_s23 = smov [#allocation8]  }
   0xf   :  { %31 = dma.vmem_to_smem %s29_s17, 16, %s461_s22, [#allocation6]  }
  0x10   :  { %s37_s24 = sshll.u32 %s462_s23, 4  ;;  %s38_s24 = int_to_ptr.vmem [resolvable:$true] %s37_s24 }
  0x11   :  { %s398_s25 = scalar_lea.vmem %s38_s24, 256  ;;  %p403_p6 = scmp.lt.s32.totalorder %s38_s24, %s38_s24 }
  0x12   :  { %p399_p5 = scmp.ne.s32.totalorder %s38_s24, %s398_s25  ;;  %p404_p7 = scmp.lt.s32.totalorder %s398_s25, %s398_s25 }
  0x14   :  { %p405_p8 = por %p404_p7, %p403_p6 }
  0x16   :  { %p406_p9 = pnand %p405_p8, %p399_p5 }
  0x18   :  { %409 = shalt.err (!%p406_p9)
}
  0x19   :  { %s463_s0 = smov 128   ;;  %s464_s1 = smov 8  }
  0x1a   :  { %43 = dma.hbm_to_vmem [thread:$0]  %s752_s2, 256, %s38_s24, [#allocation3], %s463_s0, %s463_s0, %s464_s1  }
  0x1b   :  { %s465_s28 = smov [#allocation9]  }
  0x1c   :  { %s49_s29 = sshll.u32 %s465_s28, 4  ;;  %s50_s29 = int_to_ptr.vmem [resolvable:$true] %s49_s29 }
  0x1d   :  { %s418_s30 = scalar_lea.vmem %s50_s29, 256  ;;  %p423_p11 = scmp.lt.s32.totalorder %s50_s29, %s50_s29 }
  0x1e   :  { %p419_p10 = scmp.ne.s32.totalorder %s50_s29, %s418_s30  ;;  %p424_p12 = scmp.lt.s32.totalorder %s418_s30, %s418_s30 }
  0x20   :  { %p425_p13 = por %p424_p12, %p423_p11 }
  0x22   :  { %p426_p0 = pnand %p425_p13, %p419_p10 }
  0x24   :  { %429 = shalt.err (!%p426_p0)
}
  0x25   :  { %55 = dma.hbm_to_vmem [thread:$0]  %s753_s3, 256, %s50_s29, [#allocation10], %s463_s0, %s463_s0, %s464_s1  }
  0x26   :  { %450 = dma.done.wait [#allocation5], 16  }
  0x27   :  { %451 = vsyncadd [#allocation5], 4294967280 }
  0x28   :  { %452 = dma.done.wait [#allocation6], 16  }
  0x29   :  { %453 = vsyncadd [#allocation6], 4294967280 }
  0x2a   :  { %454 = dma.done.wait [#allocation3], 256  }
  0x2b   :  { %455 = vsyncadd [#allocation3], 4294967040 }
  0x2c   :  { %456 = dma.done.wait [#allocation10], 256  }
  0x2d   :  { %457 = vsyncadd [#allocation10], 4294967040 }
  0x2e   :  { %68 = sfence }
  0x2f   :  { %s75_s2 = sld [smem:[#allocation2]]  ;;  %v510_v0 = vld [vmem:[#allocation8] sm:$0xff]  ;;  %v512_v1 = vld [vmem:[#allocation8 + $0x8] sm:$0xff]  ;;  %v564_v21 = vld [vmem:[#allocation9] sm:$0xff] }
  0x30   :  { %s313_s7 = sld [smem:[#allocation2 + $0x1]]  ;;  %vm73_vm0 = vcmp.eq.s32.totalorder %v510_v0, 0  ;;  %vm74_vm1 = vcmp.eq.s32.totalorder %v512_v1, 0  ;;  %vm83_vm2 = vcmp.eq.s32.totalorder %v510_v0, 1  ;;  %vm84_vm3 = vcmp.eq.s32.totalorder %v512_v1, 1  ;;  %v604_v37 = vld [vmem:[#allocation9 + $0x8] sm:$0xff] }
  0x31   :  { %s514_s8 = sld [smem:[#allocation7]]  ;;  %vm93_vm4 = vcmp.eq.s32.totalorder %v510_v0, 2  ;;  %vm94_vm5 = vcmp.eq.s32.totalorder %v512_v1, 2  ;;  %vm103_vm6 = vcmp.eq.s32.totalorder %v510_v0, 3  ;;  %vm104_vm7 = vcmp.eq.s32.totalorder %v512_v1, 3 }
  0x32   :  { %s315_s3 = sld [smem:[#allocation2 + $0x2]]  ;;  %vm113_vm8 = vcmp.eq.s32.totalorder %v510_v0, 4  ;;  %vm114_vm9 = vcmp.eq.s32.totalorder %v512_v1, 4  ;;  %vm123_vm10 = vcmp.eq.s32.totalorder %v510_v0, 5  ;;  %vm124_vm11 = vcmp.eq.s32.totalorder %v512_v1, 5 }
  0x33   :  { %s518_s9 = sld [smem:[#allocation7 + $0x1]]  ;;  %vm133_vm12 = vcmp.eq.s32.totalorder %v510_v0, 6  ;;  %vm134_vm13 = vcmp.eq.s32.totalorder %v512_v1, 6  ;;  %vm143_vm14 = vcmp.eq.s32.totalorder %v510_v0, 7  ;;  %vm144_vm15 = vcmp.eq.s32.totalorder %v512_v1, 7 }
  0x34   :  { %s317_s10 = sld [smem:[#allocation2 + $0x3]]  ;;  %350 = vrcp.f32 %v564_v21 }
  0x35   :  { %v76_v2 = vstv %s75_s2  ;;  %s319_s11 = sld [smem:[#allocation2 + $0x4]]  ;;  %352 = vrcp.f32 %v604_v37 }
  0x36   :  { %v77_v3 = vsel %vm73_vm0, %v76_v2, 0.0  ;;  %v78_v4 = vsel %vm74_vm1, %v76_v2, 0.0  ;;  %v86_v5 = vstv %s313_s7  ;;  %s532_s12 = sld [smem:[#allocation7 + $0x2]] }
  0x37   :  { %v87_v6 = vsel %vm83_vm2, %v86_v5, %v77_v3  ;;  %v88_v7 = vsel %vm84_vm3, %v86_v5, %v78_v4  ;;  %s321_s13 = sld [smem:[#allocation2 + $0x5]]  ;;  %v80_v9 = vstv %s514_s8 }
  0x38   :  { %v96_v8 = vstv %s315_s3  ;;  %s541_s14 = sld [smem:[#allocation7 + $0x3]]  ;;  %v81_v15 = vsel %vm73_vm0, %v80_v9, 0.0  ;;  %v82_v18 = vsel %vm74_vm1, %v80_v9, 0.0  ;;  %vm153_vm0 = vcmp.eq.s32.totalorder %v510_v0, 8 }
  0x39   :  { %v97_v10 = vsel %vm93_vm4, %v96_v8, %v87_v6  ;;  %v98_v11 = vsel %vm94_vm5, %v96_v8, %v88_v7  ;;  %s323_s15 = sld [smem:[#allocation2 + $0x6]]  ;;  %v90_v16 = vstv %s518_s9  ;;  %vm154_vm1 = vcmp.eq.s32.totalorder %v512_v1, 8  ;;  %s466_s9 = smov [#allocation11]  }
  0x3a   :  { %v106_v12 = vstv %s317_s10  ;;  %s554_s16 = sld [smem:[#allocation2 + $0x7]]  ;;  %v91_v23 = vsel %vm83_vm2, %v90_v16, %v81_v15  ;;  %v92_v27 = vsel %vm84_vm3, %v90_v16, %v82_v18  ;;  %vm163_vm2 = vcmp.eq.s32.totalorder %v510_v0, 9  ;;  %s298_s10 = sshll.u32 %s466_s9, 4  ;;  %s299_s10 = int_to_ptr.vmem [resolvable:$true] %s298_s10 }
  0x3b   :  { %v107_v13 = vsel %vm103_vm6, %v106_v12, %v97_v10  ;;  %v108_v14 = vsel %vm104_vm7, %v106_v12, %v98_v11  ;;  %v116_v17 = vstv %s319_s11  ;;  %s562_s17 = sld [smem:[#allocation7 + $0x4]]  ;;  %vm755_vm3 = vcmp.eq.s32.totalorder %v512_v1, 9  ;;  %s430_s11 = scalar_lea.vmem %s299_s10, 256 }
  0x3c   :  { %v117_v19 = vsel %vm113_vm8, %v116_v17, %v107_v13  ;;  %v118_v20 = vsel %vm114_vm9, %v116_v17, %v108_v14  ;;  %s568_s18 = sld [smem:[#allocation2 + $0x8]]  ;;  %v100_v24 = vstv %s532_s12  ;;  %p431_p1 = scmp.ne.s32.totalorder %s299_s10, %s430_s11 }
  0x3d   :  { %v126_v22 = vstv %s321_s13  ;;  %s577_s19 = sld [smem:[#allocation7 + $0x5]]  ;;  %v101_v31 = vsel %vm93_vm4, %v100_v24, %v91_v23  ;;  %v102_v34 = vsel %vm94_vm5, %v100_v24, %v92_v27  ;;  %vm173_vm4 = vcmp.eq.s32.totalorder %v510_v0, 10  ;;  %p435_p2 = scmp.lt.s32.totalorder %s299_s10, %s299_s10 }
  0x3e   :  { %v127_v25 = vsel %vm123_vm10, %v126_v22, %v117_v19  ;;  %v128_v26 = vsel %vm124_vm11, %v126_v22, %v118_v20  ;;  %s329_s20 = sld [smem:[#allocation2 + $0x9]]  ;;  %v110_v32 = vstv %s541_s14  ;;  %vm756_vm5 = vcmp.eq.s32.totalorder %v512_v1, 10  ;;  %p436_p3 = scmp.lt.s32.totalorder %s430_s11, %s430_s11 }
  0x3f   :  { %v136_v28 = vstv %s323_s15  ;;  %s594_s21 = sld [smem:[#allocation2 + $0xa]]  ;;  %v111_v39 = vsel %vm103_vm6, %v110_v32, %v101_v31  ;;  %v112_v43 = vsel %vm104_vm7, %v110_v32, %v102_v34  ;;  %vm183_vm6 = vcmp.eq.s32.totalorder %v510_v0, 11 }
  0x40   :  { %v137_v29 = vsel %vm133_vm12, %v136_v28, %v127_v25  ;;  %v138_v30 = vsel %vm134_vm13, %v136_v28, %v128_v26  ;;  %v146_v33 = vstv %s554_s16  ;;  %s598_s22 = sld [smem:[#allocation7 + $0x6]]  ;;  %vm184_vm7 = vcmp.eq.s32.totalorder %v512_v1, 11  ;;  %p437_p4 = por %p436_p3, %p435_p2 }
  0x41   :  { %v147_v35 = vsel %vm143_vm14, %v146_v33, %v137_v29  ;;  %v148_v36 = vsel %vm144_vm15, %v146_v33, %v138_v30  ;;  %s609_s23 = sld [smem:[#allocation2 + $0xb]]  ;;  %v120_v40 = vstv %s562_s17  ;;  %v661_v62 = vpop.eup %350 }
  0x42   :  { %v156_v38 = vstv %s568_s18  ;;  %s335_s24 = sld [smem:[#allocation2 + $0xc]]  ;;  %v121_v47 = vsel %vm113_vm8, %v120_v40, %v111_v39  ;;  %v122_v50 = vsel %vm114_vm9, %v120_v40, %v112_v43  ;;  %vm757_vm8 = vcmp.eq.s32.totalorder %v512_v1, 12  ;;  %v353_v17 = vpop.eup %352  ;;  %p438_p5 = pnand %p437_p4, %p431_p1 }
  0x43   :  { %v157_v41 = vsel %vm153_vm0, %v156_v38, %v147_v35  ;;  %v158_v42 = vsel %vm154_vm1, %v156_v38, %v148_v36  ;;  %s622_s25 = sld [smem:[#allocation7 + $0x7]]  ;;  %v130_v48 = vstv %s577_s19  ;;  %vm203_vm9 = vcmp.eq.s32.totalorder %v510_v0, 13 }
  0x44   :  { %v166_v44 = vstv %s329_s20  ;;  %s337_s26 = sld [smem:[#allocation2 + $0xd]]  ;;  %v131_v54 = vsel %vm123_vm10, %v130_v48, %v121_v47  ;;  %v132_v58 = vsel %vm124_vm11, %v130_v48, %v122_v50  ;;  %vm213_vm10 = vcmp.eq.s32.totalorder %v510_v0, 14 }
  0x45   :  { %v167_v45 = vsel %vm163_vm2, %v166_v44, %v157_v41  ;;  %v168_v46 = vsel %vm755_vm3, %v166_v44, %v158_v42  ;;  %v176_v49 = vstv %s594_s21  ;;  %s637_s27 = sld [smem:[#allocation7 + $0x8]]  ;;  %vm193_vm3 = vcmp.eq.s32.totalorder %v510_v0, 12 }
  0x46   :  { %v177_v51 = vsel %vm173_vm4, %v176_v49, %v167_v45  ;;  %v178_v52 = vsel %vm756_vm5, %v176_v49, %v168_v46  ;;  %s339_s28 = sld [smem:[#allocation2 + $0xe]]  ;;  %v140_v55 = vstv %s598_s22  ;;  %vm204_vm5 = vcmp.eq.s32.totalorder %v512_v1, 13 }
  0x47   :  { %v186_v53 = vstv %s609_s23  ;;  %s341_s29 = sld [smem:[#allocation2 + $0xf]]  ;;  %v141_v63 = vsel %vm133_vm12, %v140_v55, %v131_v54  ;;  %vm214_vm11 = vcmp.eq.s32.totalorder %v512_v1, 14  ;;  %v142_v3 = vsel %vm134_vm13, %v140_v55, %v132_v58 }
  0x48   :  { %v187_v56 = vsel %vm183_vm6, %v186_v53, %v177_v51  ;;  %v188_v57 = vsel %vm184_vm7, %v186_v53, %v178_v52  ;;  %v196_v59 = vstv %s335_s24  ;;  %s665_s30 = sld [smem:[#allocation7 + $0x9]]  ;;  %vm223_vm12 = vcmp.eq.s32.totalorder %v510_v0, 15 }
  0x49   :  { %v197_v60 = vsel %vm193_vm3, %v196_v59, %v187_v56  ;;  %v198_v61 = vsel %vm757_vm8, %v196_v59, %v188_v57  ;;  %v150_v4 = vstv %s622_s25  ;;  %vm224_vm8 = vcmp.eq.s32.totalorder %v512_v1, 15  ;;  %s678_s5 = sld [smem:[#allocation7 + $0xa]] }
  0x4a   :  { %v206_v2 = vstv %s337_s26  ;;  %v275_v10 = vmul.f32 %v661_v62, %v564_v21  ;;  %v151_v11 = vsel %vm143_vm14, %v150_v4, %v141_v63  ;;  %v152_v12 = vsel %vm144_vm15, %v150_v4, %v142_v3  ;;  %s695_s6 = sld [smem:[#allocation7 + $0xb]] }
  0x4b   :  { %v207_v5 = vsel %vm203_vm9, %v206_v2, %v197_v60  ;;  %v208_v6 = vsel %vm204_vm5, %v206_v2, %v198_v61  ;;  %v160_v13 = vstv %s637_s27  ;;  %s703_s2 = sld [smem:[#allocation7 + $0xc]]  ;;  %v276_v31 = vmul.f32 %v353_v17, %v604_v37 }
  0x4c   :  { %v216_v7 = vstv %s339_s28  ;;  %v161_v20 = vsel %vm153_vm0, %v160_v13, %v151_v11  ;;  %v162_v22 = vsel %vm154_vm1, %v160_v13, %v152_v12  ;;  %v277_v23 = vsub.f32 2.0, %v275_v10  ;;  %s712_s7 = sld [smem:[#allocation7 + $0xd]] }
  0x4d   :  { %v217_v8 = vsel %vm213_vm10, %v216_v7, %v207_v5  ;;  %v218_v9 = vsel %vm214_vm11, %v216_v7, %v208_v6  ;;  %v226_v14 = vstv %s341_s29  ;;  %vm758_vm13 = vcmp.eq.s32.totalorder %v512_v1, 9  ;;  %s340_s8 = sld [smem:[#allocation7 + $0xe]] }
  0x4e   :  { %v227_v15 = vsel %vm223_vm12, %v226_v14, %v217_v8  ;;  %v228_v16 = vsel %vm224_vm8, %v226_v14, %v218_v9  ;;  %v170_v24 = vstv %s665_s30  ;;  %v278_v44 = vsub.f32 2.0, %v276_v31  ;;  %s342_s3 = sld [smem:[#allocation7 + $0xf]] }
  0x4f   :  { %v233_v18 = vmul.f32 %v227_v15, %v564_v21  ;;  %v234_v19 = vmul.f32 %v228_v16, %v604_v37  ;;  %v171_v35 = vsel %vm163_vm2, %v170_v24, %v161_v20  ;;  %v172_v36 = vsel %vm758_vm13, %v170_v24, %v162_v22 }
  0x50   :  { %v180_v38 = vstv %s678_s5  ;;  %v190_v46 = vstv %s695_s6  ;;  %vm759_vm14 = vcmp.eq.s32.totalorder %v512_v1, 10  ;;  %v279_v50 = vmul.f32 %v661_v62, %v277_v23 }
  0x51   :  { %v235_v25 = vmul.f32 -0.20162, %v233_v18  ;;  %v236_v26 = vmul.f32 -0.20162, %v234_v19  ;;  %v243_v27 = vmul.f32 -0.4029, %v233_v18  ;;  %v181_v45 = vsel %vm173_vm4, %v180_v38, %v171_v35 }
  0x52   :  { %v244_v28 = vmul.f32 -0.4029, %v234_v19  ;;  %v253_v29 = vmul.f32 -0.94229, %v233_v18  ;;  %v254_v30 = vmul.f32 -0.94229, %v234_v19  ;;  %v182_v48 = vsel %vm759_vm14, %v180_v38, %v172_v36 }
  0x53   :  { %v237_v32 = vmul.f32 1.442695, %v235_v25  ;;  %v239_v33 = vmul.f32 1.442695, %v236_v26  ;;  %v245_v34 = vmul.f32 1.442695, %v243_v27  ;;  %v191_v51 = vsel %vm183_vm6, %v190_v46, %v181_v45 }
  0x54   :  { %v247_v39 = vmul.f32 1.442695, %v244_v28  ;;  %v255_v40 = vmul.f32 1.442695, %v253_v29  ;;  %v263_v41 = vmul.f32 -3.1998, %v233_v18  ;;  %v200_v52 = vstv %s703_s2 }
  0x55   :  { %354 = vpow2.f32 %v237_v32  ;;  %v264_v42 = vmul.f32 -3.1998, %v234_v19  ;;  %v257_v43 = vmul.f32 1.442695, %v254_v30  ;;  %v280_v53 = vmul.f32 %v353_v17, %v278_v44 }
  0x56   :  { %356 = vpow2.f32 %v239_v33  ;;  %v265_v47 = vmul.f32 1.442695, %v263_v41  ;;  %v192_v54 = vsel %vm184_vm7, %v190_v46, %v182_v48  ;;  %v201_v55 = vsel %vm193_vm3, %v200_v52, %v191_v51 }
  0x57   :  { %358 = vpow2.f32 %v245_v34  ;;  %v267_v49 = vmul.f32 1.442695, %v264_v42  ;;  %v210_v56 = vstv %s712_s7  ;;  %v281_v57 = vmul.f32 %v279_v50, %v564_v21 }
  0x58   :  { %360 = vpow2.f32 %v247_v39  ;;  %vm760_vm15 = vcmp.eq.s32.totalorder %v512_v1, 12  ;;  %v282_v59 = vmul.f32 %v280_v53, %v604_v37  ;;  %v211_v60 = vsel %vm203_vm9, %v210_v56, %v201_v55 }
  0x59   :  { %362 = vpow2.f32 %v255_v40  ;;  %v202_v58 = vsel %vm760_vm15, %v200_v52, %v192_v54  ;;  %v220_v61 = vstv %s340_s8  ;;  %v283_v63 = vsub.f32 2.0, %v281_v57 }
  0x5a   :  { %364 = vpow2.f32 %v257_v43  ;;  %v212_v62 = vsel %vm204_vm5, %v210_v56, %v202_v58  ;;  %v284_v3 = vsub.f32 2.0, %v282_v59  ;;  %v221_v5 = vsel %vm213_vm10, %v220_v61, %v211_v60 }
  0x5b   :  { %366 = vpow2.f32 %v265_v47  ;;  %v230_v21 = vstv %s342_s3  ;;  %v222_v37 = vsel %vm214_vm11, %v220_v61, %v212_v62  ;;  %v285_v11 = vmul.f32 %v283_v63, %v279_v50 }
  0x5c   :  { %368 = vpow2.f32 %v267_v49  ;;  %v231_v13 = vsel %vm223_vm12, %v230_v21, %v221_v5  ;;  %v286_v15 = vmul.f32 %v284_v3, %v280_v53  ;;  %v232_v17 = vsel %vm224_vm8, %v230_v21, %v222_v37 }
  0x5d   :  { %v287_v27 = vmul.f32 %v285_v11, %v231_v13 }
  0x5e   :  { %v288_v30 = vmul.f32 %v286_v15, %v232_v17 }
  0x62   :  { %v355_v2 = vpop.eup %354 }
  0x63   :  { %v357_v4 = vpop.eup %356  ;;  %v241_v6 = vmul.f32 0.02817, %v355_v2 }
  0x64   :  { %v359_v7 = vpop.eup %358  ;;  %v242_v8 = vmul.f32 0.02817, %v357_v4 }
  0x65   :  { %v361_v9 = vpop.eup %360  ;;  %v249_v10 = vmul.f32 0.28022, %v359_v7 }
  0x66   :  { %v363_v12 = vpop.eup %362  ;;  %v250_v14 = vmul.f32 0.28022, %v361_v9 }
  0x67   :  { %v365_v16 = vpop.eup %364  ;;  %v251_v18 = vadd.f32 %v249_v10, %v241_v6  ;;  %v259_v19 = vmul.f32 0.50986, %v363_v12 }
  0x68   :  { %v367_v20 = vpop.eup %366  ;;  %v252_v22 = vadd.f32 %v250_v14, %v242_v8  ;;  %v260_v23 = vmul.f32 0.50986, %v365_v16 }
  0x69   :  { %v369_v24 = vpop.eup %368  ;;  %v261_v25 = vadd.f32 %v259_v19, %v251_v18  ;;  %v269_v26 = vmul.f32 0.18175, %v367_v20 }
  0x6a   :  { %v262_v28 = vadd.f32 %v260_v23, %v252_v22  ;;  %v270_v29 = vmul.f32 0.18175, %v369_v24 }
  0x6b   :  { %v271_v0 = vadd.f32 %v269_v26, %v261_v25 }
  0x6c   :  { %v272_v31 = vadd.f32 %v270_v29, %v262_v28 }
  0x6d   :  { %v289_v32 = vmul.f32 %v287_v27, %v271_v0 }
  0x6e   :  { %v290_v33 = vmul.f32 %v288_v30, %v272_v31 }
  0x6f   :  { %291 = vst [vmem:[#allocation11] sm:$0xff] %v289_v32 }
  0x70   :  { %292 = vst [vmem:[#allocation11 + $0x8] sm:$0xff] %v290_v33 }
  0x71   :  { %441 = shalt.err (!%p438_p5)
}
  0x72   :  { %304 = dma.vmem_to_hbm [thread:$0]  %s299_s10, 256, %s754_s4, [#allocation4], %s463_s0, %s463_s0, %s464_s1  }
  0x73   :  { %458 = dma.done.wait [#allocation4], 256  }
  0x74   :  { %459 = vsyncadd [#allocation4], 4294967040 }
  0x75   :  { %308 = vsyncpa [#allocation3], 1 }
  0x76   :  { %309 = vsyncpa [#allocation10], 1 }
  0x77   :  { %310 = vsyncpa [#allocation4], 1 }
  0x78   :  { %311 = vsyncpa [#allocation5], 1 }
  0x79   :  { %312 = vsyncpa [#allocation6], 1 }

</bundles_post_ra>
